<compile_context>
chip_gen: v7x
topology: tpu7x:2x2x1
jax: 0.10.0
libtpu: 0.0.40
codegen_flags: <defaults>
</compile_context>

<pallas_src>
import math

import jax
import jax.numpy as jnp
from jax.experimental import pallas as pl
from jax.experimental.pallas import tpu as pltpu

# ---------------- model config ----------------
BATCH = 2
SEQ = 8
EMBED = 32
HEADS = 4
HEAD_DIM = EMBED // HEADS
M = BATCH * SEQ            # tokens
N = HEADS * BATCH          # folded (head, batch) dim for the attention core
LANES = 128                # embed / qkv feature dims zero-padded to one full lane width
EPS = 1e-5
SCALE = 1.0 / math.sqrt(HEAD_DIM)
APPROX_SOFTMAX_RECIP = True   # set False for exact (non-EUP) reciprocal parity


def mhsa_kernel(x_ref,        # (M, 128)  f32, embed zero-padded to 128 lanes
                wqkv_ref,     # (128, 128) bf16, x @ wqkv -> [q | k | v] on lanes 0..95
                bqkv_ref,     # (1, 128)  f32
                wo_ref,       # (32, 128) bf16, concat-heads out-proj (cols >= 32 are 0)
                bo_ref,       # (1, 128)  f32
                gamma_ref,    # (1, 128)  f32
                beta_ref,     # (1, 128)  f32
                o_ref):       # (M, 128)  f32
    x = x_ref[...]                                                      # (M, 128) f32

    # --- fused Q/K/V projection: one lane-dense bf16 MXU matmul (scale pre-folded) ---
    qkv = jnp.dot(x.astype(jnp.bfloat16), wqkv_ref[...],
                  preferred_element_type=jnp.float32) + bqkv_ref[...]   # (M, 128) f32
    qkv3 = qkv.reshape(BATCH, SEQ, LANES)

    def split_heads(off):
        # static lane slices -> (N, S, D) with n = h*BATCH + b
        return jnp.concatenate(
            [qkv3[:, :, off + h * HEAD_DIM: off + (h + 1) * HEAD_DIM]
             for h in range(HEADS)], axis=0)

    q = split_heads(0)            # (N, S, D)
    k = split_heads(EMBED)
    v = split_heads(2 * EMBED)

    # --- attention core (f32, VMEM-resident) ---
    s = jnp.einsum("nqd,nkd->nqk", q, k,
                   preferred_element_type=jnp.float32)                  # (N, S, S)
    s = s - jnp.max(s, axis=-1, keepdims=True)
    p = jnp.exp(s)
    denom = jnp.sum(p, axis=-1, keepdims=True)
    if APPROX_SOFTMAX_RECIP:
        p = p * pl.reciprocal(denom, approx=True)
    else:
        p = p / denom
    av = jnp.einsum("nqk,nkd->nqd", p, v,
                    preferred_element_type=jnp.float32)                 # (N, S, D)

    # --- merge heads on the lane dim, single concat-heads out-proj matmul ---
    cat = jnp.concatenate([av[h * BATCH:(h + 1) * BATCH] for h in range(HEADS)],
                          axis=-1)                                      # (B, S, E)
    cat = cat.reshape(M, EMBED).astype(jnp.bfloat16)
    attn = jnp.dot(cat, wo_ref[...],
                   preferred_element_type=jnp.float32) + bo_ref[...]    # (M, 128)

    # TODO(synk): dropout on attention output is identity in eval mode.

    # --- residual + LayerNorm (padded lanes of x / attn / bo are exactly 0) ---
    z = x + attn
    mu = jnp.sum(z, axis=-1, keepdims=True) * (1.0 / EMBED)
    lane = jax.lax.broadcasted_iota(jnp.int32, z.shape, 1)
    zc = jnp.where(lane < EMBED, z - mu, 0.0)        # mask pad lanes for two-pass variance
    var = jnp.sum(zc * zc, axis=-1, keepdims=True) * (1.0 / EMBED)
    o_ref[...] = zc * jax.lax.rsqrt(var + EPS) * gamma_ref[...] + beta_ref[...]


# ---------------- one-time parameter packing (hoisted out of the hot path) ----------------
def pack_params(params):
    E, H, D = EMBED, HEADS, HEAD_DIM
    w_in = params["in_proj_weight"]     # (3E, E), rows = [q; k; v] output features
    b_in = params["in_proj_bias"]       # (3E,)

    # fold the 1/sqrt(D) query scaling into the packed Q columns / bias
    scale_vec = jnp.concatenate([jnp.full((E,), SCALE, jnp.float32),
                                 jnp.ones((2 * E,), jnp.float32)])
    w_qkv = (w_in * scale_vec[:, None]).T                               # (E, 3E)
    w_qkv = jnp.pad(w_qkv, ((0, LANES - E), (0, LANES - 3 * E))).astype(jnp.bfloat16)
    b_qkv = jnp.pad(b_in * scale_vec, (0, LANES - 3 * E)).reshape(1, LANES)

    # out = concat_heads(attn) @ Wo.T + bo   ->   (H*D, LANES) weight, zero-padded lanes
    w_o = jnp.pad(params["out_proj_weight"].T,
                  ((0, 0), (0, LANES - E))).astype(jnp.bfloat16)        # (E, LANES)

    pad_row = lambda vec: jnp.pad(vec, (0, LANES - E)).reshape(1, LANES)
    return dict(w_qkv=w_qkv, b_qkv=b_qkv, w_o=w_o,
                b_o=pad_row(params["out_proj_bias"]),
                gamma=pad_row(params["ln_gamma"]),
                beta=pad_row(params["ln_beta"]))


@jax.jit
def mhsa_forward(x, packed):
    B, S, E = x.shape
    assert (B, S, E) == (BATCH, SEQ, EMBED)
    # lane-dense (B*S, 128) input slab; padded lanes are exactly 0 (LayerNorm relies on it)
    x2 = jnp.pad(x, ((0, 0), (0, 0), (0, LANES - E))).reshape(M, LANES)

    vmem = pl.BlockSpec(memory_space=pltpu.MemorySpace.VMEM)
    out = pl.pallas_call(
        mhsa_kernel,
        out_shape=jax.ShapeDtypeStruct((M, LANES), jnp.float32),
        in_specs=[vmem] * 7,
        out_specs=vmem,
    )(x2, packed["w_qkv"], packed["b_qkv"], packed["w_o"],
      packed["b_o"], packed["gamma"], packed["beta"])

    # NOTE: if the next layer can consume the padded (.., 128) slab, skip this slice.
    return out.reshape(B, S, LANES)[:, :, :E]


# ---------------- pure-JAX reference (matches PyTorch module in eval mode) ----------------
def reference(x, p):
    B, S, E = x.shape
    qkv = x @ p["in_proj_weight"].T + p["in_proj_bias"]
    q, k, v = jnp.split(qkv, 3, axis=-1)

    def split_heads(t):
        return t.reshape(B, S, HEADS, HEAD_DIM).transpose(0, 2, 1, 3)

    q, k, v = split_heads(q), split_heads(k), split_heads(v)
    s = jnp.einsum("bhqd,bhkd->bhqk", q, k) / math.sqrt(HEAD_DIM)
    a = jax.nn.softmax(s, axis=-1)
    o = jnp.einsum("bhqk,bhkd->bhqd", a, v).transpose(0, 2, 1, 3).reshape(B, S, E)
    o = o @ p["out_proj_weight"].T + p["out_proj_bias"]
    z = x + o
    mu = jnp.mean(z, axis=-1, keepdims=True)
    var = jnp.mean((z - mu) ** 2, axis=-1, keepdims=True)
    return (z - mu) / jnp.sqrt(var + EPS) * p["ln_gamma"] + p["ln_beta"]


if __name__ == "__main__":
    key = jax.random.PRNGKey(0)
    ks = jax.random.split(key, 5)

    params = {
        "in_proj_weight": 0.05 * jax.random.normal(ks[0], (3 * EMBED, EMBED), jnp.float32),
        "in_proj_bias": 0.01 * jax.random.normal(ks[1], (3 * EMBED,), jnp.float32),
        "out_proj_weight": 0.05 * jax.random.normal(ks[2], (EMBED, EMBED), jnp.float32),
        "out_proj_bias": 0.01 * jax.random.normal(ks[3], (EMBED,), jnp.float32),
        "ln_gamma": jnp.ones((EMBED,), jnp.float32),
        "ln_beta": jnp.zeros((EMBED,), jnp.float32),
    }
    x = jax.random.normal(ks[4], (BATCH, SEQ, EMBED), jnp.float32)

    packed = jax.tree_util.tree_map(jax.block_until_ready, pack_params(params))  # one-time

    out = jax.block_until_ready(mhsa_forward(x, packed))
    ref = reference(x, params)

    assert out.shape == (BATCH, SEQ, EMBED)
    err = float(jnp.max(jnp.abs(out - ref)))
    assert err < 1e-2, err   # slack for bf16 matmul inputs + EUP approx-reciprocal softmax

    print("KERNEL_OK")
</pallas_src>

<mosaic_0001>
module attributes {stable_mosaic.version = 11 : i64} {
  func.func @mhsa_kernel(%arg0: memref<16x128xf32, #tpu.memory_space<vmem>>, %arg1: memref<128x128xbf16, #tpu.memory_space<vmem>>, %arg2: memref<1x128xf32, #tpu.memory_space<vmem>>, %arg3: memref<32x128xbf16, #tpu.memory_space<vmem>>, %arg4: memref<1x128xf32, #tpu.memory_space<vmem>>, %arg5: memref<1x128xf32, #tpu.memory_space<vmem>>, %arg6: memref<1x128xf32, #tpu.memory_space<vmem>>, %arg7: memref<16x128xf32, #tpu.memory_space<vmem>>) attributes {dimension_semantics = [], scalar_prefetch = 0 : i64, scratch_operands = 0 : i64, tpu.core_type = #tpu.core_type<tc>} {
    %c0 = arith.constant 0 : index
    %c0_0 = arith.constant 0 : index
    %0 = vector.load %arg0[%c0, %c0_0] : memref<16x128xf32, #tpu.memory_space<vmem>>, vector<16x128xf32>
    %1 = arith.truncf %0 : vector<16x128xf32> to vector<16x128xbf16>
    %c0_1 = arith.constant 0 : index
    %c0_2 = arith.constant 0 : index
    %2 = vector.load %arg1[%c0_1, %c0_2] : memref<128x128xbf16, #tpu.memory_space<vmem>>, vector<128x128xbf16>
    %cst = arith.constant dense<0.000000e+00> : vector<16x128xf32>
    %3 = tpu.matmul %1, %2, %cst {dimension_numbers = #tpu.dot_dimension_numbers<[1], [0], [0], [1], [0, 0, 1, 1], [], []>} : vector<16x128xbf16>, vector<128x128xbf16>, vector<16x128xf32> -> vector<16x128xf32>
    %c0_3 = arith.constant 0 : index
    %c0_4 = arith.constant 0 : index
    %4 = vector.load %arg2[%c0_3, %c0_4] : memref<1x128xf32, #tpu.memory_space<vmem>>, vector<1x128xf32>
    %5 = vector.broadcast %4 : vector<1x128xf32> to vector<16x128xf32>
    %6 = arith.addf %3, %5 : vector<16x128xf32>
    %7 = vector.shape_cast %6 : vector<16x128xf32> to vector<2x8x128xf32>
    %8 = vector.extract_strided_slice %7 {offsets = [0, 0, 0], sizes = [2, 8, 8], strides = [1, 1, 1]} : vector<2x8x128xf32> to vector<2x8x8xf32>
    %9 = vector.extract_strided_slice %7 {offsets = [0, 0, 8], sizes = [2, 8, 8], strides = [1, 1, 1]} : vector<2x8x128xf32> to vector<2x8x8xf32>
    %10 = vector.extract_strided_slice %7 {offsets = [0, 0, 16], sizes = [2, 8, 8], strides = [1, 1, 1]} : vector<2x8x128xf32> to vector<2x8x8xf32>
    %11 = vector.extract_strided_slice %7 {offsets = [0, 0, 24], sizes = [2, 8, 8], strides = [1, 1, 1]} : vector<2x8x128xf32> to vector<2x8x8xf32>
    %12 = tpu.concatenate %8, %9, %10, %11 in 0 : vector<2x8x8xf32>, vector<2x8x8xf32>, vector<2x8x8xf32>, vector<2x8x8xf32> -> vector<8x8x8xf32>
    %13 = vector.extract_strided_slice %7 {offsets = [0, 0, 32], sizes = [2, 8, 8], strides = [1, 1, 1]} : vector<2x8x128xf32> to vector<2x8x8xf32>
    %14 = vector.extract_strided_slice %7 {offsets = [0, 0, 40], sizes = [2, 8, 8], strides = [1, 1, 1]} : vector<2x8x128xf32> to vector<2x8x8xf32>
    %15 = vector.extract_strided_slice %7 {offsets = [0, 0, 48], sizes = [2, 8, 8], strides = [1, 1, 1]} : vector<2x8x128xf32> to vector<2x8x8xf32>
    %16 = vector.extract_strided_slice %7 {offsets = [0, 0, 56], sizes = [2, 8, 8], strides = [1, 1, 1]} : vector<2x8x128xf32> to vector<2x8x8xf32>
    %17 = tpu.concatenate %13, %14, %15, %16 in 0 : vector<2x8x8xf32>, vector<2x8x8xf32>, vector<2x8x8xf32>, vector<2x8x8xf32> -> vector<8x8x8xf32>
    %18 = vector.extract_strided_slice %7 {offsets = [0, 0, 64], sizes = [2, 8, 8], strides = [1, 1, 1]} : vector<2x8x128xf32> to vector<2x8x8xf32>
    %19 = vector.extract_strided_slice %7 {offsets = [0, 0, 72], sizes = [2, 8, 8], strides = [1, 1, 1]} : vector<2x8x128xf32> to vector<2x8x8xf32>
    %20 = vector.extract_strided_slice %7 {offsets = [0, 0, 80], sizes = [2, 8, 8], strides = [1, 1, 1]} : vector<2x8x128xf32> to vector<2x8x8xf32>
    %21 = vector.extract_strided_slice %7 {offsets = [0, 0, 88], sizes = [2, 8, 8], strides = [1, 1, 1]} : vector<2x8x128xf32> to vector<2x8x8xf32>
    %22 = tpu.concatenate %18, %19, %20, %21 in 0 : vector<2x8x8xf32>, vector<2x8x8xf32>, vector<2x8x8xf32>, vector<2x8x8xf32> -> vector<8x8x8xf32>
    "tpu.trace_start"() <{level = 10 : i32, message = "nqd,nkd->nqk"}> : () -> ()
    %cst_5 = arith.constant dense<0.000000e+00> : vector<8x8x8xf32>
    %23 = tpu.matmul %12, %17, %cst_5 {dimension_numbers = #tpu.dot_dimension_numbers<[2], [2], [1], [1], [0, 0, 0, 1, 1, 1], [0], [0]>} : vector<8x8x8xf32>, vector<8x8x8xf32>, vector<8x8x8xf32> -> vector<8x8x8xf32>
    "tpu.trace_stop"() : () -> ()
    %cst_6 = arith.constant dense<0xFF800000> : vector<8x8xf32>
    %24 = vector.multi_reduction <maximumf>, %23, %cst_6 [2] : vector<8x8x8xf32> to vector<8x8xf32>
    %25 = vector.shape_cast %24 : vector<8x8xf32> to vector<8x8x1xf32>
    %26 = vector.broadcast %25 : vector<8x8x1xf32> to vector<8x8x8xf32>
    %27 = arith.subf %23, %26 : vector<8x8x8xf32>
    %28 = math.exp %27 : vector<8x8x8xf32>
    %cst_7 = arith.constant dense<0.000000e+00> : vector<8x8xf32>
    %29 = vector.multi_reduction <add>, %28, %cst_7 [2] : vector<8x8x8xf32> to vector<8x8xf32>
    %30 = vector.shape_cast %29 : vector<8x8xf32> to vector<8x8x1xf32>
    %31 = tpu.reciprocal %30 {approx = true} : vector<8x8x1xf32> -> vector<8x8x1xf32>
    %32 = vector.broadcast %31 : vector<8x8x1xf32> to vector<8x8x8xf32>
    %33 = arith.mulf %28, %32 : vector<8x8x8xf32>
    "tpu.trace_start"() <{level = 10 : i32, message = "nqk,nkd->nqd"}> : () -> ()
    %cst_8 = arith.constant dense<0.000000e+00> : vector<8x8x8xf32>
    %34 = tpu.matmul %33, %22, %cst_8 {dimension_numbers = #tpu.dot_dimension_numbers<[2], [1], [1], [2], [0, 0, 0, 1, 1, 2], [0], [0]>} : vector<8x8x8xf32>, vector<8x8x8xf32>, vector<8x8x8xf32> -> vector<8x8x8xf32>
    "tpu.trace_stop"() : () -> ()
    %35 = vector.extract_strided_slice %34 {offsets = [0, 0, 0], sizes = [2, 8, 8], strides = [1, 1, 1]} : vector<8x8x8xf32> to vector<2x8x8xf32>
    %36 = vector.extract_strided_slice %34 {offsets = [2, 0, 0], sizes = [2, 8, 8], strides = [1, 1, 1]} : vector<8x8x8xf32> to vector<2x8x8xf32>
    %37 = vector.extract_strided_slice %34 {offsets = [4, 0, 0], sizes = [2, 8, 8], strides = [1, 1, 1]} : vector<8x8x8xf32> to vector<2x8x8xf32>
    %38 = vector.extract_strided_slice %34 {offsets = [6, 0, 0], sizes = [2, 8, 8], strides = [1, 1, 1]} : vector<8x8x8xf32> to vector<2x8x8xf32>
    %39 = tpu.concatenate %35, %36, %37, %38 in 2 : vector<2x8x8xf32>, vector<2x8x8xf32>, vector<2x8x8xf32>, vector<2x8x8xf32> -> vector<2x8x32xf32>
    %40 = vector.shape_cast %39 : vector<2x8x32xf32> to vector<16x32xf32>
    %41 = arith.truncf %40 : vector<16x32xf32> to vector<16x32xbf16>
    %c0_9 = arith.constant 0 : index
    %c0_10 = arith.constant 0 : index
    %42 = vector.load %arg3[%c0_9, %c0_10] : memref<32x128xbf16, #tpu.memory_space<vmem>>, vector<32x128xbf16>
    %cst_11 = arith.constant dense<0.000000e+00> : vector<16x128xf32>
    %43 = tpu.matmul %41, %42, %cst_11 {dimension_numbers = #tpu.dot_dimension_numbers<[1], [0], [0], [1], [0, 0, 1, 1], [], []>} : vector<16x32xbf16>, vector<32x128xbf16>, vector<16x128xf32> -> vector<16x128xf32>
    %c0_12 = arith.constant 0 : index
    %c0_13 = arith.constant 0 : index
    %44 = vector.load %arg4[%c0_12, %c0_13] : memref<1x128xf32, #tpu.memory_space<vmem>>, vector<1x128xf32>
    %45 = vector.broadcast %44 : vector<1x128xf32> to vector<16x128xf32>
    %46 = arith.addf %43, %45 : vector<16x128xf32>
    %47 = arith.addf %0, %46 : vector<16x128xf32>
    %cst_14 = arith.constant dense<0.000000e+00> : vector<16xf32>
    %48 = vector.multi_reduction <add>, %47, %cst_14 [1] : vector<16x128xf32> to vector<16xf32>
    %49 = vector.shape_cast %48 : vector<16xf32> to vector<16x1xf32>
    %cst_15 = arith.constant 3.125000e-02 : f32
    %50 = vector.broadcast %cst_15 : f32 to vector<16x1xf32>
    %51 = arith.mulf %49, %50 : vector<16x1xf32>
    %52 = tpu.iota {dimensions = array<i32: 1>} : vector<16x128xi32>
    %c32_i32 = arith.constant 32 : i32
    %53 = vector.broadcast %c32_i32 : i32 to vector<16x128xi32>
    %54 = arith.cmpi slt, %52, %53 : vector<16x128xi32>
    %55 = vector.broadcast %51 : vector<16x1xf32> to vector<16x128xf32>
    %56 = arith.subf %47, %55 : vector<16x128xf32>
    %cst_16 = arith.constant 0.000000e+00 : f32
    %57 = vector.broadcast %cst_16 : f32 to vector<16x128xf32>
    %58 = arith.select %54, %56, %57 : vector<16x128xi1>, vector<16x128xf32>
    %59 = arith.mulf %58, %58 : vector<16x128xf32>
    %cst_17 = arith.constant dense<0.000000e+00> : vector<16xf32>
    %60 = vector.multi_reduction <add>, %59, %cst_17 [1] : vector<16x128xf32> to vector<16xf32>
    %61 = vector.shape_cast %60 : vector<16xf32> to vector<16x1xf32>
    %cst_18 = arith.constant 3.125000e-02 : f32
    %62 = vector.broadcast %cst_18 : f32 to vector<16x1xf32>
    %63 = arith.mulf %61, %62 : vector<16x1xf32>
    %cst_19 = arith.constant 9.99999974E-6 : f32
    %64 = vector.broadcast %cst_19 : f32 to vector<16x1xf32>
    %65 = arith.addf %63, %64 : vector<16x1xf32>
    %66 = math.rsqrt %65 : vector<16x1xf32>
    %67 = vector.broadcast %66 : vector<16x1xf32> to vector<16x128xf32>
    %68 = arith.mulf %58, %67 : vector<16x128xf32>
    %c0_20 = arith.constant 0 : index
    %c0_21 = arith.constant 0 : index
    %69 = vector.load %arg5[%c0_20, %c0_21] : memref<1x128xf32, #tpu.memory_space<vmem>>, vector<1x128xf32>
    %70 = vector.broadcast %69 : vector<1x128xf32> to vector<16x128xf32>
    %71 = arith.mulf %68, %70 : vector<16x128xf32>
    %c0_22 = arith.constant 0 : index
    %c0_23 = arith.constant 0 : index
    %72 = vector.load %arg6[%c0_22, %c0_23] : memref<1x128xf32, #tpu.memory_space<vmem>>, vector<1x128xf32>
    %73 = vector.broadcast %72 : vector<1x128xf32> to vector<16x128xf32>
    %74 = arith.addf %71, %73 : vector<16x128xf32>
    %c0_24 = arith.constant 0 : index
    %c0_25 = arith.constant 0 : index
    %75 = vector.load %arg7[%c0_24, %c0_25] : memref<16x128xf32, #tpu.memory_space<vmem>>, vector<16x128xf32>
    tpu.vector_store %arg7[%c0_24, %c0_25], %74 {strides = array<i32>} : memref<16x128xf32, #tpu.memory_space<vmem>>, vector<16x128xf32>,
    return
  }
}

</mosaic_0001>

<bundles_post_ra>
// kernel: mhsa_forward.1
= control target key start
LH: loop header
LB: loop body
LE: loop exit
PB: predicated region body
PF: predicated region fallthrough
CT: control target
= control target key end

     0   :  { %12 = vsyncpa [#allocation3], 0  ;;  %s2241_s0 = inlined_call_operand.vmem [shape: f32[16,128], index: 0, kind: input, shape index: {}]   ;;  %s2242_s1 = inlined_call_operand.hbm [shape: bf16[128,128], index: 1, kind: input, shape index: {}]   ;;  %s2243_s2 = inlined_call_operand.vmem [shape: f32[1,128], index: 2, kind: input, shape index: {}]   ;;  %s2244_s3 = inlined_call_operand.vmem [shape: bf16[32,128], index: 3, kind: input, shape index: {}]   ;;  %s2245_s4 = inlined_call_operand.vmem [shape: f32[1,128], index: 4, kind: input, shape index: {}]   ;;  %s2246_s5 = inlined_call_operand.vmem [shape: f32[1,128], index: 5, kind: input, shape index: {}]   ;;  %s2247_s6 = inlined_call_operand.vmem [shape: f32[1,128], index: 6, kind: input, shape index: {}]   ;;  %s2248_s7 = inlined_call_operand.hbm [shape: f32[16,128], index: 7, kind: output, shape index: {}]  }
   0x1   :  { %13 = vsyncpa [#allocation4], 0  ;;  %s1957_s24 = smov [#allocation2]   ;;  %s1909_s28 = scalar_lea.hbm %s2242_s1, 1024 }
   0x2   :  { %s21_s25 = sshll.u32 %s1957_s24, 4  ;;  %p1910_p0 = scmp.ne.s32.totalorder %s2242_s1, %s1909_s28  ;;  %s22_s25 = int_to_ptr.vmem [resolvable:$true] %s21_s25 }
   0x3   :  { %p1913_p1 = scmp.lt.u32.totalorder %s1909_s28, %s2242_s1 }
   0x5   :  { %p1915_p2 = pnand %p1913_p1, %p1910_p0 }
   0x7   :  { %1918 = shalt.err (!%p1915_p2)
}
   0x8   :  { %s1919_s10 = scalar_lea.vmem %s22_s25, 1024  ;;  %p1924_p4 = scmp.lt.s32.totalorder %s22_s25, %s22_s25 }
   0x9   :  { %p1920_p3 = scmp.ne.s32.totalorder %s22_s25, %s1919_s10  ;;  %p1925_p5 = scmp.lt.s32.totalorder %s1919_s10, %s1919_s10 }
   0xb   :  { %p1926_p6 = por %p1925_p5, %p1924_p4 }
   0xd   :  { %p1927_p7 = pnand %p1926_p6, %p1920_p3 }
   0xf   :  { %1930 = shalt.err (!%p1927_p7)
}
  0x10   :  { %s1958_s11 = smov 64   ;;  %s1959_s12 = smov 4  }
  0x11   :  { %27 = dma.hbm_to_vmem [thread:$0]  %s2242_s1, 1024, %s22_s25, [#allocation3], %s1958_s11, %s1958_s11, %s1959_s12  }
  0x12   :  { %1953 = dma.done.wait [#allocation3], 1024  }
  0x13   :  { %1954 = vsyncadd [#allocation3], 4294966272  ;;  %v1960_v0 = vmov 0.0   ;;  %vm1961_vm0 = vmmov 0   ;;  %v1863_v1 = vld [vmem:[#allocation2] sm:$0xff]   ;;  %v1864_v2 = vld [vmem:[#allocation2 + $0x8] sm:$0xff]  }
  0x14   :  { %1726 = vmatprep.subr.bf16.mxu0 %v1960_v0  ;;  %1742 = vmatprep.mubr.msk.bf16.mxu0 %vm1961_vm0, %v1960_v0  ;;  %v1865_v3 = vld [vmem:[#allocation2 + $0x10] sm:$0xff]   ;;  %v1866_v4 = vld [vmem:[#allocation2 + $0x18] sm:$0xff]   ;;  %v1867_v5 = vld [vmem:[#allocation2 + $0x20] sm:$0xff]   ;;  %s1963_s20 = smov 120   ;;  %s1964_s21 = smov 104   ;;  %vm173_vm1 = vcmask 64512  }
  0x15   :  { %1751 = vmatprep.subr.mxu1 %v1960_v0  ;;  %1753 = vmatprep.mubr.msk.f32.mxu1 %vm1961_vm0, %v1960_v0  ;;  %v1868_v6 = vld [vmem:[#allocation2 + $0x28] sm:$0xff]   ;;  %v1869_v7 = vld [vmem:[#allocation2 + $0x30] sm:$0xff]   ;;  %v1870_v8 = vld [vmem:[#allocation2 + $0x38] sm:$0xff]   ;;  %s1966_s26 = smov 8   ;;  %s1967_s27 = smov 16   ;;  %vm1502_vm2 = vcmask 130048  }
  0x16   :  { %1727 = vmatpush3.bf16.msra.mxu0 %v1863_v1  ;;  %v2040_v9 = vld [vmem:[%s2241_s0] sm:$0xff]  ;;  %v2045_v10 = vld [vmem:[%s2241_s0 + $0x8] sm:$0xff]  ;;  %s1962_s0 = smov 112   ;;  %s1968_s28 = smov 24   ;;  %vm1505_vm3 = vcmask 195584   ;;  %vm1532_vm4 = vcmask 261120  }
  0x17   :  { %1728 = vmatprep.subr.bf16.mxu0 %v1960_v0  ;;  %v44_v11 = vpack.c.bf16 %v2045_v10, %v2040_v9  ;;  %v1643_v12 = vld [vmem:[%s2243_s2] ss:$0 sm:$0xff]  ;;  %s1965_s2 = smov 96   ;;  %s1969_s10 = smov [#allocation5]  }
  0x1a   :  { %1729 = vmatpush3.bf16.msra.mxu0 %v1864_v2 }
  0x1b   :  { %1730 = vmatprep.subr.bf16.mxu0 %v1960_v0 }
  0x1e   :  { %1731 = vmatpush3.bf16.msra.mxu0 %v1865_v3 }
  0x1f   :  { %1732 = vmatprep.subr.bf16.mxu0 %v1960_v0 }
  0x22   :  { %1733 = vmatpush3.bf16.msra.mxu0 %v1866_v4 }
  0x23   :  { %1734 = vmatprep.subr.bf16.mxu0 %v1960_v0 }
  0x26   :  { %1735 = vmatpush3.bf16.msra.mxu0 %v1867_v5 }
  0x27   :  { %1736 = vmatprep.subr.bf16.mxu0 %v1960_v0 }
  0x2a   :  { %1737 = vmatpush3.bf16.msra.mxu0 %v1868_v6 }
  0x2b   :  { %1738 = vmatprep.subr.bf16.mxu0 %v1960_v0 }
  0x2e   :  { %1739 = vmatpush3.bf16.msra.mxu0 %v1869_v7 }
  0x2f   :  { %1740 = vmatprep.subr.bf16.mxu0 %v1960_v0 }
  0x32   :  { %1741 = vmatpush3.bf16.msra.mxu0 %v1870_v8 }
  0x33   :  { %1746 = vmatprep.subr.mxu0 %v1960_v0 }
  0x35   :  { %1743 = vmatmul.mubr.bf16.vlgmr.msra.gmra.mrb[0].mxu0 %v44_v11 }
  0x36   :  { %1748 = vmatprep.mubr.msk.f32.mxu0 %vm1961_vm0, %v1960_v0 }
 0x108   :  { %v150_v13 = vpop.f32.mrb[0].mxu0 }
 0x109   :  { %v2056_v14 = vadd.f32 %v1643_v12, %v150_v13  ;;  %v1744_v15 = vpop.f32.mrb[1].mxu0 }
 0x10a   :  { %v153_v16 = vpop.f32.mrb[2].mxu0 }
 0x10b   :  { %163 = vrot.lane.b32.xlu1 %v2056_v14, %s1962_s0  ;;  %159 = vrot.lane.b32.xlu0 %v2056_v14, %s1963_s20  ;;  %v1745_v17 = vpop.f32.mrb[3].mxu0  ;;  %v2060_v18 = vadd.f32 %v1643_v12, %v153_v16 }
 0x10f   :  { %165 = vrot.lane.b32.xlu1 %v2060_v18, %s1962_s0  ;;  %161 = vrot.lane.b32.xlu0 %v2060_v18, %s1963_s20 }
 0x113   :  { %169 = vrot.lane.b32.xlu1 %v2060_v18, %s1964_s21  ;;  %167 = vrot.lane.b32.xlu0 %v2056_v14, %s1964_s21 }
 0x117   :  { %248 = vrot.lane.b32.xlu0 %v2060_v18, %s1965_s2 }
 0x17d   :  { %v2067_v19 = vpop.permute.xlu1 %163  ;;  %v2069_v20 = vpop.permute.xlu0 %159 }
 0x17e   :  { %324 = vrot.lane.b32.xlu1 %v2069_v20, %s1965_s2 }
 0x181   :  { %v2072_v21 = vpop.permute.xlu0 %161  ;;  %v2076_v22 = vpop.permute.xlu1 %165 }
 0x182   :  { %171 = vrot.lane.b32.xlu1 %v2056_v14, %s1965_s2  ;;  %400 = vrot.lane.b32.xlu0 %v2072_v21, %s1965_s2 }
 0x185   :  { %v2078_v23 = vpop.permute.xlu0 %167  ;;  %v2082_v24 = vpop.permute.xlu1 %169 }
 0x186   :  { %552 = vrot.lane.b32.xlu1 %v2076_v22, %s1965_s2  ;;  %476 = vrot.lane.b32.xlu0 %v2067_v19, %s1965_s2 }
 0x189   :  { %v249_v25 = vpop.permute.xlu0 %248 }
 0x18a   :  { %704 = vrot.lane.b32.xlu1 %v2082_v24, %s1965_s2  ;;  %628 = vrot.lane.b32.xlu0 %v2078_v23, %s1965_s2 }
 0x18b   :  { %1752 = vmatpush3.xpose.msk.msra.mxu1 %vm173_vm1, %v249_v25 }
 0x18c   :  { %1756 = vmatprep.subr.mxu1 %v1960_v0 }
 0x18e   :  { %1754 = vmatmul.mubr.msk.f32.vlgmr.msra.gmra.mrb[0].mxu1 %vm173_vm1, %v2060_v18 }
 0x18f   :  { %1758 = vmatprep.mubr.msk.f32.mxu1 %vm1961_vm0, %v1960_v0 }
 0x1f0   :  { %v325_v26 = vpop.permute.xlu1 %324 }
 0x1f1   :  { %1757 = vmatpush3.xpose.msk.msra.mxu1 %vm173_vm1, %v325_v26 }
 0x1f2   :  { %1761 = vmatprep.subr.mxu1 %v1960_v0 }
 0x1f4   :  { %v172_v27 = vpop.permute.xlu1 %171  ;;  %1759 = vmatmul.mubr.msk.f32.vlgmr.msra.gmra.mrb[2].mxu1 %vm173_vm1, %v2069_v20  ;;  %v401_v28 = vpop.permute.xlu0 %400 }
 0x1f5   :  { %1747 = vmatpush3.xpose.msk.msra.mxu0 %vm173_vm1, %v172_v27  ;;  %1762 = vmatpush3.xpose.msk.msra.mxu1 %vm173_vm1, %v401_v28 }
 0x1f6   :  { %1763 = vmatprep.mubr.msk.f32.mxu1 %vm1961_vm0, %v1960_v0  ;;  %1766 = vmatprep.subr.mxu1 %v1960_v0 }
 0x1f7   :  { %1791 = vmatprep.subr.mxu0 %v1960_v0 }
 0x1f8   :  { %1749 = vmatmul.mubr.msk.f32.vlgmr.msra.gmra.mrb[4].mxu0 %vm173_vm1, %v2056_v14  ;;  %1764 = vmatmul.mubr.msk.f32.vlgmr.msra.gmra.mrb[4].mxu1 %vm173_vm1, %v2072_v21  ;;  %v477_v29 = vpop.permute.xlu0 %476  ;;  %v553_v30 = vpop.permute.xlu1 %552 }
 0x1f9   :  { %1767 = vmatpush3.xpose.msk.msra.mxu1 %vm173_vm1, %v477_v29  ;;  %1768 = vmatprep.mubr.msk.f32.mxu1 %vm1961_vm0, %v1960_v0 }
 0x1fa   :  { %1771 = vmatprep.subr.mxu1 %v1960_v0  ;;  %1793 = vmatprep.mubr.msk.f32.mxu0 %vm1961_vm0, %v1960_v0 }
 0x1fc   :  { %1769 = vmatmul.mubr.msk.f32.vlgmr.msra.gmra.mrb[6].mxu1 %vm173_vm1, %v2067_v19  ;;  %v629_v31 = vpop.permute.xlu0 %628  ;;  %v705_v32 = vpop.permute.xlu1 %704 }
 0x1fd   :  { %1772 = vmatpush3.xpose.msk.msra.mxu1 %vm173_vm1, %v553_v30  ;;  %1773 = vmatprep.mubr.msk.f32.mxu1 %vm1961_vm0, %v1960_v0 }
 0x1fe   :  { %1776 = vmatprep.subr.mxu1 %v1960_v0 }
 0x200   :  { %1774 = vmatmul.mubr.msk.f32.vlgmr.msra.gmra.mrb[8].mxu1 %vm173_vm1, %v2076_v22 }
 0x201   :  { %1777 = vmatpush3.xpose.msk.msra.mxu1 %vm173_vm1, %v629_v31  ;;  %1778 = vmatprep.mubr.msk.f32.mxu1 %vm1961_vm0, %v1960_v0 }
 0x202   :  { %1781 = vmatprep.subr.mxu1 %v1960_v0 }
 0x204   :  { %1779 = vmatmul.mubr.msk.f32.vlgmr.msra.gmra.mrb[10].mxu1 %vm173_vm1, %v2078_v23 }
 0x205   :  { %1782 = vmatpush3.xpose.msk.msra.mxu1 %vm173_vm1, %v705_v32  ;;  %1783 = vmatprep.mubr.msk.f32.mxu1 %vm1961_vm0, %v1960_v0 }
 0x206   :  { %1786 = vmatprep.subr.mxu1 %v1960_v0 }
 0x208   :  { %1784 = vmatmul.mubr.msk.f32.vlgmr.msra.gmra.mrb[12].mxu1 %vm173_vm1, %v2082_v24 }
 0x209   :  { %1788 = vmatprep.mubr.msk.f32.mxu1 %vm1961_vm0, %v1960_v0 }
 0x261   :  { %v320_v33 = vpop.f32.mrb[0].mxu1 }
 0x262   :  { %v1755_v34 = vpop.f32.mrb[1].mxu1  ;;  %v783_v35 = vsel %vm173_vm1, %v320_v33, -inf }
 0x263   :  { %784 = vmax.xlane.f32.xlu1 %v783_v35 }
 0x2c7   :  { %v396_v36 = vpop.f32.mrb[2].mxu1 }
 0x2c8   :  { %v1760_v37 = vpop.f32.mrb[3].mxu1  ;;  %v786_v46 = vsel %vm173_vm1, %v396_v36, -inf }
 0x2cb   :  { %v244_v38 = vpop.f32.mrb[4].mxu0  ;;  %v472_v39 = vpop.f32.mrb[4].mxu1 }
 0x2cc   :  { %v1750_v40 = vpop.f32.mrb[5].mxu0  ;;  %v1765_v41 = vpop.f32.mrb[5].mxu1  ;;  %v780_v42 = vsel %vm173_vm1, %v244_v38, -inf  ;;  %v789_v49 = vsel %vm173_vm1, %v472_v39, -inf }
 0x2cd   :  { %781 = vmax.xlane.f32.xlu0 %v780_v42 }
 0x2cf   :  { %v548_v43 = vpop.f32.mrb[6].mxu1 }
 0x2d0   :  { %v1770_v44 = vpop.f32.mrb[7].mxu1  ;;  %v792_v45 = vsel %vm173_vm1, %v548_v43, -inf }
 0x2d1   :  { %793 = vmax.xlane.f32.xlu1 %v792_v45  ;;  %787 = vmax.xlane.f32.xlu0 %v786_v46 }
 0x2d3   :  { %v624_v47 = vpop.f32.mrb[8].mxu1 }
 0x2d4   :  { %v1775_v48 = vpop.f32.mrb[9].mxu1  ;;  %v795_v53 = vsel %vm173_vm1, %v624_v47, -inf }
 0x2d5   :  { %790 = vmax.xlane.f32.xlu0 %v789_v49 }
 0x2d7   :  { %v700_v50 = vpop.f32.mrb[10].mxu1 }
 0x2d8   :  { %v1780_v51 = vpop.f32.mrb[11].mxu1  ;;  %v798_v52 = vsel %vm173_vm1, %v700_v50, -inf }
 0x2d9   :  { %799 = vmax.xlane.f32.xlu1 %v798_v52  ;;  %796 = vmax.xlane.f32.xlu0 %v795_v53 }
 0x2db   :  { %v776_v54 = vpop.f32.mrb[12].mxu1 }
 0x2dc   :  { %v1785_v55 = vpop.f32.mrb[13].mxu1  ;;  %v801_v56 = vsel %vm173_vm1, %v776_v54, -inf }
 0x2dd   :  { %802 = vmax.xlane.f32.xlu0 %v801_v56 }
 0x2ea   :  { %868 = vrot.lane.b32.xlu1 %v2056_v14, %s1958_s11 }
 0x2ee   :  { %1020 = vrot.lane.b32.xlu1 %v2069_v20, %s1958_s11 }
 0x2f0   :  { %v785_v57 = vpop.xlane.xlu1 %784 }
 0x2f1   :  { %v805_v58 = vsub.f32 %v320_v33, %v785_v57 }
 0x2f2   :  { %1096 = vrot.lane.b32.xlu1 %v2072_v21, %s1958_s11 }
 0x2f3   :  { %944 = vrot.lane.b32.xlu0 %v2060_v18, %s1958_s11  ;;  %v814_v59 = vmul.f32 1.442695, %v805_v58 }
 0x2f5   :  { %1873 = vpow2.f32 %v814_v59 }
 0x2f6   :  { %1248 = vrot.lane.b32.xlu1 %v2076_v22, %s1958_s11 }
 0x2f7   :  { %1172 = vrot.lane.b32.xlu0 %v2067_v19, %s1958_s11 }
 0x2ff   :  { %v2154_v60 = vpop.eup %1873 }
 0x300   :  { %v831_v61 = vsel %vm173_vm1, %v2154_v60, 0.0 }
 0x316   :  { %832 = vadd.xlane.f32.xlu0 %v831_v61 }
 0x35a   :  { %v782_v62 = vpop.xlane.xlu0 %781 }
 0x35b   :  { %v804_v63 = vsub.f32 %v244_v38, %v782_v62 }
 0x35d   :  { %v812_v1 = vmul.f32 1.442695, %v804_v63 }
 0x35e   :  { %v794_v2 = vpop.xlane.xlu1 %793  ;;  %v788_v3 = vpop.xlane.xlu0 %787 }
 0x35f   :  { %1875 = vpow2.f32 %v812_v1  ;;  %v808_v4 = vsub.f32 %v548_v43, %v794_v2  ;;  %v806_v5 = vsub.f32 %v396_v36, %v788_v3 }
 0x361   :  { %v816_v6 = vmul.f32 1.442695, %v806_v5  ;;  %v820_v7 = vmul.f32 1.442695, %v808_v4 }
 0x362   :  { %v791_v8 = vpop.xlane.xlu0 %790 }
 0x363   :  { %v807_v11 = vsub.f32 %v472_v39, %v791_v8  ;;  %1877 = vpow2.f32 %v816_v6 }
 0x364   :  { %1879 = vpow2.f32 %v820_v7 }
 0x365   :  { %v818_v12 = vmul.f32 1.442695, %v807_v11 }
 0x366   :  { %v800_v13 = vpop.xlane.xlu1 %799  ;;  %v797_v14 = vpop.xlane.xlu0 %796 }
 0x367   :  { %1881 = vpow2.f32 %v818_v12  ;;  %v810_v15 = vsub.f32 %v700_v50, %v800_v13  ;;  %v809_v16 = vsub.f32 %v624_v47, %v797_v14  ;;  %v1871_v12 = vld [vmem:[%s2244_s3] sm:$0xff]  }
 0x369   :  { %v1876_v17 = vpop.eup %1875  ;;  %v824_v18 = vmul.f32 1.442695, %v810_v15  ;;  %v822_v19 = vmul.f32 1.442695, %v809_v16 }
 0x36a   :  { %v869_v20 = vpop.permute.xlu1 %868  ;;  %v803_v21 = vpop.xlane.xlu0 %802  ;;  %v828_v22 = vsel %vm173_vm1, %v1876_v17, 0.0 }
 0x36b   :  { %1883 = vpow2.f32 %v824_v18  ;;  %v811_v25 = vsub.f32 %v776_v54, %v803_v21  ;;  %1787 = vmatpush3.msra.mxu1 %v869_v20  ;;  %829 = vadd.xlane.f32.xlu1 %v828_v22  ;;  %v1872_v18 = vld [vmem:[%s2244_s3 + $0x8] sm:$0xff]  }
 0x36c   :  { %1885 = vpow2.f32 %v822_v19  ;;  %1796 = vmatprep.subr.mxu1 %v1960_v0 }
 0x36d   :  { %v826_v26 = vmul.f32 1.442695, %v811_v25  ;;  %v1878_v27 = vpop.eup %1877 }
 0x36e   :  { %v945_v28 = vpop.permute.xlu0 %944  ;;  %v834_v29 = vsel %vm173_vm1, %v1878_v27, 0.0  ;;  %v1880_v30 = vpop.eup %1879 }
 0x36f   :  { %1887 = vpow2.f32 %v826_v26  ;;  %1792 = vmatpush3.msra.mxu0 %v945_v28  ;;  %835 = vadd.xlane.f32.xlu1 %v834_v29  ;;  %v840_v33 = vsel %vm173_vm1, %v1880_v30, 0.0  ;;  %v1021_v42 = vpop.permute.xlu1 %1020 }
 0x370   :  { %1801 = vmatprep.subr.mxu0 %v1960_v0 }
 0x371   :  { %v1882_v31 = vpop.eup %1881 }
 0x372   :  { %v837_v32 = vsel %vm173_vm1, %v1882_v31, 0.0  ;;  %v1173_v40 = vpop.permute.xlu0 %1172 }
 0x373   :  { %838 = vadd.xlane.f32.xlu0 %v837_v32  ;;  %841 = vadd.xlane.f32.xlu1 %v840_v33  ;;  %v1097_v45 = vpop.permute.xlu1 %1096 }
 0x375   :  { %v1884_v34 = vpop.eup %1883 }
 0x376   :  { %v2164_v35 = vpop.eup %1885  ;;  %v846_v36 = vsel %vm173_vm1, %v1884_v34, 0.0 }
 0x377   :  { %v843_v37 = vsel %vm173_vm1, %v2164_v35, 0.0  ;;  %847 = vadd.xlane.f32.xlu1 %v846_v36 }
 0x378   :  { %844 = vadd.xlane.f32.xlu0 %v843_v37 }
 0x379   :  { %v2169_v38 = vpop.eup %1887 }
 0x37a   :  { %v849_v39 = vsel %vm173_vm1, %v2169_v38, 0.0 }
 0x37c   :  { %850 = vadd.xlane.f32.xlu0 %v849_v39 }
 0x388   :  { %1400 = vrot.lane.b32.xlu1 %v2082_v24, %s1958_s11  ;;  %v1249_v24 = vpop.permute.xlu1 %1248 }
 0x392   :  { %1324 = vrot.lane.b32.xlu0 %v2078_v23, %s1958_s11  ;;  %s1631_s11 = sshll.u32 %s1969_s10, 4  ;;  %s1632_s11 = int_to_ptr.vmem [resolvable:$true] %s1631_s11 }
 0x393   :  { %s1931_s12 = scalar_lea.vmem %s1632_s11, 256  ;;  %p1936_p9 = scmp.lt.s32.totalorder %s1632_s11, %s1632_s11 }
 0x394   :  { %p1932_p8 = scmp.ne.s32.totalorder %s1632_s11, %s1931_s12  ;;  %p1937_p10 = scmp.lt.s32.totalorder %s1931_s12, %s1931_s12 }
 0x396   :  { %p1938_p11 = por %p1937_p10, %p1936_p9 }
 0x398   :  { %p1939_p12 = pnand %p1938_p11, %p1932_p8 }
 0x3a3   :  { %v833_v41 = vpop.xlane.xlu0 %832 }
 0x3a4   :  { %1889 = vrcp.f32 %v833_v41 }
 0x3ae   :  { %v1890_v43 = vpop.eup %1889 }
 0x3af   :  { %v861_v44 = vmul.f32 %v1890_v43, %v2154_v60 }
 0x3b1   :  { %1794 = vmatmul.mubr.msk.f32.vlgmr.msra.gmra.mrb[6].mxu0 %vm173_vm1, %v861_v44 }
 0x3b2   :  { %1802 = vmatpush3.msra.mxu0 %v1097_v45  ;;  %1803 = vmatprep.mubr.msk.f32.mxu0 %vm1961_vm0, %v1960_v0  ;;  %v1676_v45 = vld [vmem:[%s2245_s4] ss:$0 sm:$0xff] }
 0x3b3   :  { %1811 = vmatprep.subr.mxu0 %v1960_v0 }
 0x3f8   :  { %v830_v46 = vpop.xlane.xlu1 %829 }
 0x3f9   :  { %1891 = vrcp.f32 %v830_v46 }
 0x3fc   :  { %v836_v23 = vpop.xlane.xlu1 %835 }
 0x3fd   :  { %1893 = vrcp.f32 %v836_v23 }
 0x400   :  { %v839_v47 = vpop.xlane.xlu0 %838  ;;  %v842_v48 = vpop.xlane.xlu1 %841 }
 0x401   :  { %1895 = vrcp.f32 %v839_v47 }
 0x402   :  { %1897 = vrcp.f32 %v842_v48 }
 0x403   :  { %v1892_v49 = vpop.eup %1891 }
 0x404   :  { %v860_v50 = vmul.f32 %v1892_v49, %v1876_v17  ;;  %v848_v51 = vpop.xlane.xlu1 %847 }
 0x405   :  { %v845_v52 = vpop.xlane.xlu0 %844  ;;  %1899 = vrcp.f32 %v848_v51 }
 0x406   :  { %1789 = vmatmul.mubr.msk.f32.vlgmr.msra.gmra.mrb[14].mxu1 %vm173_vm1, %v860_v50  ;;  %1901 = vrcp.f32 %v845_v52  ;;  %v1585_v52 = vlaneseq }
 0x407   :  { %1797 = vmatpush3.msra.mxu1 %v1021_v42  ;;  %1798 = vmatprep.mubr.msk.f32.mxu1 %vm1961_vm0, %v1960_v0  ;;  %v1894_v53 = vpop.eup %1893 }
 0x408   :  { %1806 = vmatprep.subr.mxu1 %v1960_v0  ;;  %v862_v54 = vmul.f32 %v1894_v53, %v1878_v27  ;;  %v1401_v3 = vpop.permute.xlu1 %1400  ;;  %v1586_v53 = vand.u32 127, %v1585_v52 }
 0x409   :  { %v851_v55 = vpop.xlane.xlu0 %850 }
 0x40a   :  { %1903 = vrcp.f32 %v851_v55  ;;  %1799 = vmatmul.mubr.msk.f32.vlgmr.msra.gmra.mrb[16].mxu1 %vm173_vm1, %v862_v54  ;;  %vm1587_vm5 = vcmp.lt.s32.totalorder %v1586_v53, 32 }
 0x40b   :  { %v1896_v56 = vpop.eup %1895  ;;  %1807 = vmatpush3.msra.mxu1 %v1173_v40  ;;  %1808 = vmatprep.mubr.msk.f32.mxu1 %vm1961_vm0, %v1960_v0 }
 0x40c   :  { %v1898_v57 = vpop.eup %1897  ;;  %v863_v58 = vmul.f32 %v1896_v56, %v1882_v31  ;;  %1816 = vmatprep.subr.mxu1 %v1960_v0 }
 0x40d   :  { %v864_v59 = vmul.f32 %v1898_v57, %v1880_v30  ;;  %v1325_v60 = vpop.permute.xlu0 %1324 }
 0x40e   :  { %1804 = vmatmul.mubr.msk.f32.vlgmr.msra.gmra.mrb[8].mxu0 %vm173_vm1, %v863_v58 }
 0x40f   :  { %1809 = vmatmul.mubr.msk.f32.vlgmr.msra.gmra.mrb[18].mxu1 %vm173_vm1, %v864_v59  ;;  %1812 = vmatpush3.msra.mxu0 %v1249_v24  ;;  %v1900_v61 = vpop.eup %1899 }
 0x410   :  { %1817 = vmatpush3.msra.mxu1 %v1325_v60  ;;  %1813 = vmatprep.mubr.msk.f32.mxu0 %vm1961_vm0, %v1960_v0  ;;  %v1902_v62 = vpop.eup %1901  ;;  %v866_v63 = vmul.f32 %v1900_v61, %v1884_v34 }
 0x411   :  { %1818 = vmatprep.mubr.msk.f32.mxu1 %vm1961_vm0, %v1960_v0  ;;  %1821 = vmatprep.subr.mxu0 %v1960_v0  ;;  %v865_v1 = vmul.f32 %v1902_v62, %v2164_v35 }
 0x412   :  { %1826 = vmatprep.subr.bf16.mxu1 %v1960_v0 }
 0x413   :  { %1819 = vmatmul.mubr.msk.f32.vlgmr.msra.gmra.mrb[20].mxu1 %vm173_vm1, %v866_v63  ;;  %1814 = vmatmul.mubr.msk.f32.vlgmr.msra.gmra.mrb[10].mxu0 %vm173_vm1, %v865_v1 }
 0x414   :  { %v1904_v2 = vpop.eup %1903  ;;  %1830 = vmatprep.mubr.msk.bf16.mxu1 %vm1961_vm0, %v1960_v0  ;;  %1822 = vmatpush3.msra.mxu0 %v1401_v3 }
 0x415   :  { %v867_v4 = vmul.f32 %v1904_v2, %v2169_v38  ;;  %1823 = vmatprep.mubr.msk.f32.mxu0 %vm1961_vm0, %v1960_v0  ;;  %1827 = vmatpush3.bf16.msra.mxu1 %v1871_v12 }
 0x416   :  { %1828 = vmatprep.subr.bf16.mxu1 %v1960_v0 }
 0x417   :  { %1824 = vmatmul.mubr.msk.f32.vlgmr.msra.gmra.mrb[12].mxu0 %vm173_vm1, %v867_v4 }
 0x419   :  { %1829 = vmatpush3.bf16.msra.mxu1 %v1872_v18 }
 0x484   :  { %v1016_v5 = vpop.f32.mrb[6].mxu0 }
 0x485   :  { %v1795_v6 = vpop.f32.mrb[7].mxu0 }
 0x486   :  { %v1680_v6 = vld [vmem:[%s2246_s5] ss:$0 sm:$0xff] }
 0x4d9   :  { %v940_v7 = vpop.f32.mrb[14].mxu1 }
 0x4da   :  { %v1790_v8 = vpop.f32.mrb[15].mxu1 }
 0x4dd   :  { %v1092_v11 = vpop.f32.mrb[16].mxu1 }
 0x4de   :  { %v1800_v13 = vpop.f32.mrb[17].mxu1 }
 0x4e1   :  { %v1168_v14 = vpop.f32.mrb[8].mxu0 }
 0x4e2   :  { %v1848_v15 = vpack.i.bf16 %v1168_v14, %v1092_v11  ;;  %v1244_v16 = vpop.f32.mrb[18].mxu1  ;;  %v1805_v17 = vpop.f32.mrb[9].mxu0  ;;  %v1681_v11 = vld [vmem:[%s2247_s6] ss:$0 sm:$0xff] }
 0x4e3   :  { %v1810_v19 = vpop.f32.mrb[19].mxu1 }
 0x4e4   :  { %1849 = vrot.lane.b32.xlu0 %v1848_v15, %s1966_s26 }
 0x4e6   :  { %v1396_v20 = vpop.f32.mrb[20].mxu1  ;;  %v1320_v21 = vpop.f32.mrb[10].mxu0 }
 0x4e7   :  { %v1820_v22 = vpop.f32.mrb[21].mxu1  ;;  %v1853_v25 = vpack.i.bf16 %v1320_v21, %v1244_v16  ;;  %v1815_v26 = vpop.f32.mrb[11].mxu0 }
 0x4e9   :  { %1854 = vrot.lane.b32.xlu1 %v1853_v25, %s1967_s27 }
 0x4ea   :  { %v1472_v0 = vpop.f32.mrb[12].mxu0 }
 0x4eb   :  { %v1858_v27 = vpack.i.bf16 %v1472_v0, %v1396_v20  ;;  %v1825_v28 = vpop.f32.mrb[13].mxu0 }
 0x4ed   :  { %1859 = vrot.lane.b32.xlu0 %v1858_v27, %s1968_s28 }
 0x556   :  { %v1850_v29 = vpop.permute.xlu0 %1849 }
 0x557   :  { %v1852_v31 = vunpack.i.h.bf16 %v1850_v29  ;;  %v1851_v32 = vunpack.i.l.bf16 %v1850_v29 }
 0x559   :  { %v1501_v36 = vsel %vm173_vm1, %v1016_v5, %v1852_v31  ;;  %v1500_v37 = vsel %vm173_vm1, %v940_v7, %v1851_v32 }
 0x55b   :  { %v1855_v30 = vpop.permute.xlu1 %1854 }
 0x55c   :  { %v1857_v33 = vunpack.i.h.bf16 %v1855_v30  ;;  %v1856_v34 = vunpack.i.l.bf16 %v1855_v30 }
 0x55e   :  { %v1504_v40 = vsel %vm1502_vm2, %v1501_v36, %v1857_v33  ;;  %v1503_v41 = vsel %vm1502_vm2, %v1500_v37, %v1856_v34 }
 0x55f   :  { %v1860_v35 = vpop.permute.xlu0 %1859 }
 0x560   :  { %v1862_v38 = vunpack.i.h.bf16 %v1860_v35  ;;  %v1861_v39 = vunpack.i.l.bf16 %v1860_v35 }
 0x562   :  { %v1507_v42 = vsel %vm1505_vm3, %v1504_v40, %v1862_v38  ;;  %v1506_v43 = vsel %vm1505_vm3, %v1503_v41, %v1861_v39 }
 0x563   :  { %v1508_v44 = vpack.c.bf16 %v1507_v42, %v1506_v43 }
 0x565   :  { %1831 = vmatmul.mubr.msk.bf16.vlgmr.msra.gmra.mrb[24].mxu1 %vm1532_vm4, %v1508_v44 }
 0x638   :  { %v1570_v24 = vpop.f32.mrb[24].mxu1 }
 0x639   :  { %v1571_v46 = vadd.f32 %v1676_v45, %v1570_v24  ;;  %v1832_v23 = vpop.f32.mrb[25].mxu1 }
 0x63a   :  { %v1573_v47 = vpop.f32.mrb[26].mxu1 }
 0x63b   :  { %v1574_v48 = vadd.f32 %v1676_v45, %v1573_v47  ;;  %v1833_v49 = vpop.f32.mrb[27].mxu1  ;;  %v1577_v50 = vadd.f32 %v1571_v46, %v2040_v9 }
 0x63d   :  { %1579 = vadd.xlane.f32.xlu1 %v1577_v50  ;;  %v1578_v51 = vadd.f32 %v1574_v48, %v2045_v10 }
 0x63f   :  { %1581 = vadd.xlane.f32.xlu0 %v1578_v51 }
 0x6ca   :  { %v1580_v54 = vpop.xlane.xlu1 %1579 }
 0x6cb   :  { %v1583_v55 = vmul.f32 0.03125, %v1580_v54 }
 0x6cc   :  { %v1582_v56 = vpop.xlane.xlu0 %1581 }
 0x6cd   :  { %v1588_v57 = vsub.f32 %v1577_v50, %v1583_v55  ;;  %v1584_v58 = vmul.f32 0.03125, %v1582_v56 }
 0x6cf   :  { %v1589_v59 = vsub.f32 %v1578_v51, %v1584_v58  ;;  %v1590_v60 = vsel %vm1587_vm5, %v1588_v57, 0.0 }
 0x6d0   :  { %v1592_v61 = vmul.f32 %v1590_v60, %v1590_v60 }
 0x6d1   :  { %v1591_v62 = vsel %vm1587_vm5, %v1589_v59, 0.0 }
 0x6d2   :  { %1594 = vadd.xlane.f32.xlu0 %v1592_v61  ;;  %v1593_v63 = vmul.f32 %v1591_v62, %v1591_v62 }
 0x6d4   :  { %1596 = vadd.xlane.f32.xlu1 %v1593_v63 }
 0x75f   :  { %v1595_v9 = vpop.xlane.xlu0 %1594 }
 0x760   :  { %v1598_v1 = vmul.f32 0.03125, %v1595_v9 }
 0x761   :  { %v1597_v2 = vpop.xlane.xlu1 %1596 }
 0x762   :  { %v1600_v10 = vadd.f32 1e-05, %v1598_v1  ;;  %v1599_v3 = vmul.f32 0.03125, %v1597_v2 }
 0x764   :  { %1905 = vrsqrt.f32 %v1600_v10  ;;  %v1601_v4 = vadd.f32 1e-05, %v1599_v3 }
 0x766   :  { %1907 = vrsqrt.f32 %v1601_v4 }
 0x76e   :  { %v1906_v5 = vpop.eup %1905 }
 0x76f   :  { %v1604_v7 = vmul.f32 %v1906_v5, %v1590_v60 }
 0x770   :  { %v1908_v8 = vpop.eup %1907 }
 0x771   :  { %v1605_v12 = vmul.f32 %v1908_v8, %v1591_v62  ;;  %v1613_v13 = vmul.f32 %v1680_v6, %v1604_v7 }
 0x773   :  { %v1614_v14 = vmul.f32 %v1680_v6, %v1605_v12  ;;  %v1622_v15 = vadd.f32 %v1681_v11, %v1613_v13 }
 0x775   :  { %v1623_v16 = vadd.f32 %v1681_v11, %v1614_v14  ;;  %1624 = vst [vmem:[#allocation5] sm:$0xff] %v1622_v15 }
 0x777   :  { %1625 = vst [vmem:[#allocation5 + $0x8] sm:$0xff] %v1623_v16 }
 0x778   :  { %1942 = shalt.err (!%p1939_p12)
}
 0x779   :  { %s1943_s6 = scalar_lea.hbm %s2248_s7, 256 }
 0x77a   :  { %p1944_p13 = scmp.ne.s32.totalorder %s2248_s7, %s1943_s6  ;;  %p1947_p0 = scmp.lt.u32.totalorder %s1943_s6, %s2248_s7 }
 0x77c   :  { %p1949_p1 = pnand %p1947_p0, %p1944_p13 }
 0x77e   :  { %1952 = shalt.err (!%p1949_p1)
}
 0x77f   :  { %s1970_s17 = smov 128  }
 0x780   :  { %1637 = dma.vmem_to_hbm [thread:$0]  %s1632_s11, 256, %s2248_s7, [#allocation4], %s1970_s17, %s1970_s17, %s1966_s26  }
 0x781   :  { %1955 = dma.done.wait [#allocation4], 256  }
 0x782   :  { %1956 = vsyncadd [#allocation4], 4294967040 }
 0x783   :  { %1641 = vsyncpa [#allocation3], 1 }
 0x784   :  { %1642 = vsyncpa [#allocation4], 1 }

</bundles_post_ra>
